<compile_context>
chip_gen: v7x
topology: tpu7x:2x2x1
jax: 0.10.0
libtpu: 0.0.40
codegen_flags: <defaults>
</compile_context>

<pallas_src>
import jax
import jax.numpy as jnp
from jax.experimental import pallas as pl
from jax.experimental.pallas import tpu as pltpu

IMAGE_SIZE = 28 * 28      # 784
HIDDEN = 50
NUM_CLASSES = 10
HPAD = 128                # hidden dim padded to one full lane tile
NPAD = 128                # output dim padded to one full lane tile
TB_MAX = 2048             # max batch tile (amortizes per-step overhead)


def _round_up(n, m):
    return ((n + m - 1) // m) * m


def _cdiv(a, b):
    return (a + b - 1) // b


def _batch_tiling(B):
    """Choose (TB, padded_batch, num_tiles) for batch size B.

    - At least 2 tiles once B >= 32 so both v7x TensorCores get grid steps.
    - No tile exceeds TB_MAX.
    - Host-side padding only for tiny batches (a handful of rows); larger
      ragged batches rely on Pallas' masked boundary block instead of a full
      jnp.pad copy of x.
    """
    if B <= 8:
        return B, B, 1                         # block == full batch dim (legal)
    n = max(_cdiv(B, TB_MAX), 2 if B >= 32 else 1)
    TB = _round_up(_cdiv(B, n), 16)
    if TB >= B:                                # tiny batch: one tile, few pad rows
        return TB, TB, 1
    return TB, B, _cdiv(B, TB)                 # ragged last tile masked by Pallas


def mnist_mlp_kernel(x_ref, w1_ref, b1_ref, w2_ref, b2_ref, o_ref):
    # fc1: cast the f32 x tile to bf16 in-VMEM (no separate HBM convert pass),
    # bf16 @ bf16 on the MXU with f32 accumulation; bias + ReLU in f32.
    x_bf = x_ref[...].astype(jnp.bfloat16)
    h = jnp.dot(x_bf, w1_ref[...], preferred_element_type=jnp.float32)
    h = jnp.maximum(h + b1_ref[...], 0.0)
    # fc2 kept fully in f32 (tiny 128x128 matmul, hidden under the x DMA).
    out = jnp.dot(h, w2_ref[...], preferred_element_type=jnp.float32)
    o_ref[...] = (out + b2_ref[...]).astype(o_ref.dtype)   # bf16 lane-dense store


def prepare_params(w1, b1, w2, b2):
    """One-time pad/cast of the weights into kernel layout.

    w1: (784, 50), b1: (50,), w2: (50, 10), b2: (10,) -- stored transposed
    relative to torch so the kernel computes x @ W directly (== x @ W_torch.T).
    """
    w1p = jnp.zeros((IMAGE_SIZE, HPAD), jnp.bfloat16).at[:, :HIDDEN].set(
        w1.astype(jnp.bfloat16))
    b1p = jnp.zeros((1, HPAD), jnp.float32).at[0, :HIDDEN].set(
        b1.astype(jnp.float32))
    w2p = jnp.zeros((HPAD, NPAD), jnp.float32).at[:HIDDEN, :NUM_CLASSES].set(
        w2.astype(jnp.float32))
    b2p = jnp.zeros((1, NPAD), jnp.float32).at[0, :NUM_CLASSES].set(
        b2.astype(jnp.float32))
    return w1p, b1p, w2p, b2p


@jax.jit
def mnist_forward(x, params):
    """x: (B, 1, 28, 28) (or any (..., 784)) float32 -> logits (B, 10) float32."""
    w1p, b1p, w2p, b2p = params
    x2d = x.reshape(-1, IMAGE_SIZE)            # same as torch .reshape(-1, 784)
    B = x2d.shape[0]

    TB, B_eff, grid = _batch_tiling(B)
    if B_eff != B:                             # tiny batches only (< 16 extra rows)
        x2d = jnp.pad(x2d, ((0, B_eff - B), (0, 0)))

    # VMEM budget: every spec is double-buffered by the pipeline.
    x_tile_bytes = TB * IMAGE_SIZE * 4         # f32 x tile
    out_tile_bytes = TB * NPAD * 2             # bf16 out tile
    weight_bytes = (IMAGE_SIZE * HPAD * 2      # W1 bf16
                    + HPAD * NPAD * 4          # W2 f32
                    + 2 * NPAD * 4)            # biases f32
    vmem_limit = 2 * (x_tile_bytes + out_tile_bytes + weight_bytes) + (4 << 20)

    n_rows = grid * TB
    cost = pl.CostEstimate(
        flops=2 * n_rows * IMAGE_SIZE * HPAD + 2 * n_rows * HPAD * NPAD,
        transcendentals=0,
        bytes_accessed=n_rows * IMAGE_SIZE * 4 + n_rows * NPAD * 2 + weight_bytes,
    )

    out_padded = pl.pallas_call(
        mnist_mlp_kernel,
        out_shape=jax.ShapeDtypeStruct((B_eff, NPAD), jnp.bfloat16),
        grid=(grid,),
        in_specs=[
            pl.BlockSpec((TB, IMAGE_SIZE), lambda i: (i, 0)),    # x tile (pipelined)
            pl.BlockSpec((IMAGE_SIZE, HPAD), lambda i: (0, 0)),  # W1 (VMEM-resident)
            pl.BlockSpec((1, HPAD), lambda i: (0, 0)),           # b1
            pl.BlockSpec((HPAD, NPAD), lambda i: (0, 0)),        # W2
            pl.BlockSpec((1, NPAD), lambda i: (0, 0)),           # b2
        ],
        out_specs=pl.BlockSpec((TB, NPAD), lambda i: (i, 0)),    # lane-dense bf16 out
        compiler_params=pltpu.CompilerParams(
            dimension_semantics=("parallel",),
            vmem_limit_bytes=int(vmem_limit),
        ),
        cost_estimate=cost,
    )(x2d, w1p, b1p, w2p, b2p)

    # Strip batch padding and the zero-padded class columns, upcast to f32.
    # (Keep the slice before any argmax/softmax so padded classes never win.)
    return out_padded[:B, :NUM_CLASSES].astype(jnp.float32)


def init_params(key):
    """Deterministic init mimicking torch.nn.Linear U(-1/sqrt(fan_in), 1/sqrt(fan_in))."""
    k1, k2, k3, k4 = jax.random.split(key, 4)
    bound1 = 1.0 / (IMAGE_SIZE ** 0.5)
    bound2 = 1.0 / (HIDDEN ** 0.5)
    w1 = jax.random.uniform(k1, (IMAGE_SIZE, HIDDEN), jnp.float32, -bound1, bound1)
    b1 = jax.random.uniform(k2, (HIDDEN,), jnp.float32, -bound1, bound1)
    w2 = jax.random.uniform(k3, (HIDDEN, NUM_CLASSES), jnp.float32, -bound2, bound2)
    b2 = jax.random.uniform(k4, (NUM_CLASSES,), jnp.float32, -bound2, bound2)
    return w1, b1, w2, b2


if __name__ == "__main__":
    key = jax.random.PRNGKey(0)
    kx, kp = jax.random.split(key)

    B = 8
    x = jax.random.normal(kx, (B, 1, 28, 28), jnp.float32)   # NCHW, like MNIST
    w1, b1, w2, b2 = init_params(kp)
    params = prepare_params(w1, b1, w2, b2)                   # one-time pad/cast

    logits = mnist_forward(x, params)
    jax.block_until_ready(logits)

    # Pure-JAX reference applying the same roundings the kernel uses:
    # bf16 x / W1 operands, f32 accumulation, f32 fc2, bf16 final store.
    def bf(a):
        return a.astype(jnp.bfloat16).astype(jnp.float32)
    x2d = x.reshape(B, IMAGE_SIZE)
    h_ref = jnp.maximum(bf(x2d) @ bf(w1) + b1, 0.0)
    ref = bf(h_ref @ w2 + b2)

    assert logits.shape == (B, NUM_CLASSES)
    assert jnp.allclose(logits, ref, atol=2e-2, rtol=2e-2), (
        float(jnp.max(jnp.abs(logits - ref))))

    print("KERNEL_OK")
</pallas_src>

<mosaic_0001>
module attributes {stable_mosaic.version = 11 : i64} {
  func.func @mnist_mlp_kernel(%arg0: i32, %arg1: memref<8x784xf32, #tpu.memory_space<vmem>>, %arg2: memref<784x128xbf16, #tpu.memory_space<vmem>>, %arg3: memref<1x128xf32, #tpu.memory_space<vmem>>, %arg4: memref<128x128xf32, #tpu.memory_space<vmem>>, %arg5: memref<1x128xf32, #tpu.memory_space<vmem>>, %arg6: memref<8x128xbf16, #tpu.memory_space<vmem>>) attributes {dimension_semantics = [#tpu.dimension_semantics<parallel>], iteration_bounds = array<i64: 1>, scalar_prefetch = 0 : i64, scratch_operands = 0 : i64, tpu.core_type = #tpu.core_type<tc>, window_params = [{transform_indices = @transform_0, window_bounds = array<i64: 8, 784>}, {pipeline_mode = #tpu.pipeline_mode<synchronous>, transform_indices = @transform_1, window_bounds = array<i64: 784, 128>}, {pipeline_mode = #tpu.pipeline_mode<synchronous>, transform_indices = @transform_2, window_bounds = array<i64: 1, 128>}, {pipeline_mode = #tpu.pipeline_mode<synchronous>, transform_indices = @transform_3, window_bounds = array<i64: 128, 128>}, {pipeline_mode = #tpu.pipeline_mode<synchronous>, transform_indices = @transform_4, window_bounds = array<i64: 1, 128>}, {transform_indices = @transform_5, window_bounds = array<i64: 8, 128>}]} {
    %c0 = arith.constant 0 : index
    %c0_0 = arith.constant 0 : index
    %0 = vector.load %arg1[%c0, %c0_0] : memref<8x784xf32, #tpu.memory_space<vmem>>, vector<8x784xf32>
    %1 = arith.truncf %0 : vector<8x784xf32> to vector<8x784xbf16>
    %c0_1 = arith.constant 0 : index
    %c0_2 = arith.constant 0 : index
    %2 = vector.load %arg2[%c0_1, %c0_2] : memref<784x128xbf16, #tpu.memory_space<vmem>>, vector<784x128xbf16>
    %cst = arith.constant dense<0.000000e+00> : vector<8x128xf32>
    %3 = tpu.matmul %1, %2, %cst {dimension_numbers = #tpu.dot_dimension_numbers<[1], [0], [0], [1], [0, 0, 1, 1], [], []>} : vector<8x784xbf16>, vector<784x128xbf16>, vector<8x128xf32> -> vector<8x128xf32>
    %c0_3 = arith.constant 0 : index
    %c0_4 = arith.constant 0 : index
    %4 = vector.load %arg3[%c0_3, %c0_4] : memref<1x128xf32, #tpu.memory_space<vmem>>, vector<1x128xf32>
    %5 = vector.broadcast %4 : vector<1x128xf32> to vector<8x128xf32>
    %6 = arith.addf %3, %5 : vector<8x128xf32>
    %cst_5 = arith.constant 0.000000e+00 : f32
    %7 = vector.broadcast %cst_5 : f32 to vector<8x128xf32>
    %8 = arith.maximumf %6, %7 : vector<8x128xf32>
    %c0_6 = arith.constant 0 : index
    %c0_7 = arith.constant 0 : index
    %9 = vector.load %arg4[%c0_6, %c0_7] : memref<128x128xf32, #tpu.memory_space<vmem>>, vector<128x128xf32>
    %cst_8 = arith.constant dense<0.000000e+00> : vector<8x128xf32>
    %10 = tpu.matmul %8, %9, %cst_8 {dimension_numbers = #tpu.dot_dimension_numbers<[1], [0], [0], [1], [0, 0, 1, 1], [], []>} : vector<8x128xf32>, vector<128x128xf32>, vector<8x128xf32> -> vector<8x128xf32>
    %c0_9 = arith.constant 0 : index
    %c0_10 = arith.constant 0 : index
    %11 = vector.load %arg5[%c0_9, %c0_10] : memref<1x128xf32, #tpu.memory_space<vmem>>, vector<1x128xf32>
    %12 = vector.broadcast %11 : vector<1x128xf32> to vector<8x128xf32>
    %13 = arith.addf %10, %12 : vector<8x128xf32>
    %14 = arith.truncf %13 : vector<8x128xf32> to vector<8x128xbf16>
    %c0_11 = arith.constant 0 : index
    %c0_12 = arith.constant 0 : index
    %15 = vector.load %arg6[%c0_11, %c0_12] : memref<8x128xbf16, #tpu.memory_space<vmem>>, vector<8x128xbf16>
    tpu.vector_store %arg6[%c0_11, %c0_12], %14 {strides = array<i32>} : memref<8x128xbf16, #tpu.memory_space<vmem>>, vector<8x128xbf16>,
    return
  }
  func.func @transform_0(%arg0: i32) -> (i32, i32) {
    %c0_i32 = arith.constant 0 : i32
    %c0_i32_0 = arith.constant 0 : i32
    return %arg0, %c0_i32 : i32, i32
  }
  func.func @transform_1(%arg0: i32) -> (i32, i32) {
    %c0_i32 = arith.constant 0 : i32
    %c0_i32_0 = arith.constant 0 : i32
    %c0_i32_1 = arith.constant 0 : i32
    return %c0_i32, %c0_i32_0 : i32, i32
  }
  func.func @transform_2(%arg0: i32) -> (i32, i32) {
    %c0_i32 = arith.constant 0 : i32
    %c0_i32_0 = arith.constant 0 : i32
    %c0_i32_1 = arith.constant 0 : i32
    return %c0_i32, %c0_i32_0 : i32, i32
  }
  func.func @transform_3(%arg0: i32) -> (i32, i32) {
    %c0_i32 = arith.constant 0 : i32
    %c0_i32_0 = arith.constant 0 : i32
    %c0_i32_1 = arith.constant 0 : i32
    return %c0_i32, %c0_i32_0 : i32, i32
  }
  func.func @transform_4(%arg0: i32) -> (i32, i32) {
    %c0_i32 = arith.constant 0 : i32
    %c0_i32_0 = arith.constant 0 : i32
    %c0_i32_1 = arith.constant 0 : i32
    return %c0_i32, %c0_i32_0 : i32, i32
  }
  func.func @transform_5(%arg0: i32) -> (i32, i32) {
    %c0_i32 = arith.constant 0 : i32
    %c0_i32_0 = arith.constant 0 : i32
    return %arg0, %c0_i32 : i32, i32
  }
}

</mosaic_0001>

<bundles_post_ra>
// kernel: mnist_forward.1
= control target key start
LH: loop header
LB: loop body
LE: loop exit
PB: predicated region body
PF: predicated region fallthrough
CT: control target
= control target key end

     0   :  { %v952_v44 = vmov 0.0   ;;  %vm953_vm0 = vmmov 0   ;;  %vm434_vm1 = vcmask 130048   ;;  %s1212_s1 = inlined_call_operand.vmem [shape: bf16[784,128], index: 1, kind: input, shape index: {}]   ;;  %s1213_s0 = inlined_call_operand.vmem [shape: f32[8,784], index: 0, kind: input, shape index: {}]   ;;  %s1214_s3 = inlined_call_operand.vmem [shape: f32[128,128], index: 3, kind: input, shape index: {}]   ;;  %s1215_s2 = inlined_call_operand.vmem [shape: f32[1,128], index: 2, kind: input, shape index: {}]   ;;  %s1216_s4 = inlined_call_operand.vmem [shape: f32[1,128], index: 4, kind: input, shape index: {}]   ;;  %s1217_s5 = inlined_call_operand.vmem [shape: bf16[8,128], index: 5, kind: output, shape index: {}]  }
   0x1   :  { %v903_v0 = vld [vmem:[%s1212_s1 + $0x40] sm:$0xff]   ;;  %v907_v4 = vld [vmem:[%s1212_s1 + $0x48] sm:$0xff]   ;;  %v911_v8 = vld [vmem:[%s1212_s1 + $0x50] sm:$0xff]  }
   0x2   :  { %v904_v1 = vld [vmem:[%s1212_s1] sm:$0xff]   ;;  %750 = vmatprep.subr.bf16.mxu0 %v903_v0  ;;  %v908_v5 = vld [vmem:[%s1212_s1 + $0x8] sm:$0xff]   ;;  %v912_v9 = vld [vmem:[%s1212_s1 + $0x10] sm:$0xff]   ;;  %v954_v0 = vmov 0.0|0.0  }
   0x3   :  { %v905_v2 = vld [vmem:[%s1212_s1 + $0xc0] sm:$0xff]   ;;  %751 = vmatpush3.bf16.msra.mxu0 %v904_v1  ;;  %v909_v6 = vld [vmem:[%s1212_s1 + $0xc8] sm:$0xff]   ;;  %v913_v10 = vld [vmem:[%s1212_s1 + $0xd0] sm:$0xff]  }
   0x4   :  { %v906_v3 = vld [vmem:[%s1212_s1 + $0x80] sm:$0xff]   ;;  %772 = vmatprep.subr.bf16.mxu1 %v905_v2  ;;  %752 = vmatprep.subr.bf16.mxu0 %v907_v4  ;;  %v910_v7 = vld [vmem:[%s1212_s1 + $0x88] sm:$0xff]   ;;  %v914_v11 = vld [vmem:[%s1212_s1 + $0x90] sm:$0xff]  }
   0x5   :  { %773 = vmatpush3.bf16.msra.mxu1 %v906_v3  ;;  %v915_v12 = vld [vmem:[%s1212_s1 + $0x58] sm:$0xff]   ;;  %v919_v16 = vld [vmem:[%s1212_s1 + $0x60] sm:$0xff]   ;;  %v923_v20 = vld [vmem:[%s1212_s1 + $0x68] sm:$0xff]  }
   0x6   :  { %774 = vmatprep.subr.bf16.mxu1 %v909_v6  ;;  %v916_v13 = vld [vmem:[%s1212_s1 + $0x18] sm:$0xff]   ;;  %v920_v17 = vld [vmem:[%s1212_s1 + $0x20] sm:$0xff]   ;;  %v924_v21 = vld [vmem:[%s1212_s1 + $0x28] sm:$0xff]  }
   0x7   :  { %753 = vmatpush3.bf16.msra.mxu0 %v908_v5  ;;  %v917_v14 = vld [vmem:[%s1212_s1 + $0xd8] sm:$0xff]   ;;  %v921_v18 = vld [vmem:[%s1212_s1 + $0xe0] sm:$0xff]   ;;  %v925_v22 = vld [vmem:[%s1212_s1 + $0xe8] sm:$0xff]  }
   0x8   :  { %754 = vmatprep.subr.bf16.mxu0 %v911_v8  ;;  %v918_v15 = vld [vmem:[%s1212_s1 + $0x98] sm:$0xff]   ;;  %v922_v19 = vld [vmem:[%s1212_s1 + $0xa0] sm:$0xff]   ;;  %v926_v23 = vld [vmem:[%s1212_s1 + $0xa8] sm:$0xff]  }
   0x9   :  { %775 = vmatpush3.bf16.msra.mxu1 %v910_v7  ;;  %v927_v24 = vld [vmem:[%s1212_s1 + $0x70] sm:$0xff]   ;;  %v931_v28 = vld [vmem:[%s1212_s1 + $0x78] sm:$0xff]   ;;  %v22_v31 = vld [vmem:[%s1213_s0 + $0x8] sm:$0xff] }
   0xa   :  { %776 = vmatprep.subr.bf16.mxu1 %v913_v10  ;;  %v928_v25 = vld [vmem:[%s1212_s1 + $0x30] sm:$0xff]   ;;  %v932_v29 = vld [vmem:[%s1212_s1 + $0x38] sm:$0xff]   ;;  %v29_v32 = vpack.c.bf16 %v22_v31, %v22_v31  ;;  %v21_v34 = vld [vmem:[%s1213_s0] sm:$0xff] }
   0xb   :  { %755 = vmatpush3.bf16.msra.mxu0 %v912_v9  ;;  %v929_v26 = vld [vmem:[%s1212_s1 + $0xf0] sm:$0xff]   ;;  %v933_v30 = vld [vmem:[%s1212_s1 + $0xf8] sm:$0xff]   ;;  %v28_v35 = vpack.c.bf16 %v21_v34, %v21_v34  ;;  %v935_v36 = vld [vmem:[%s1212_s1 + $0x140] sm:$0xff]  }
   0xc   :  { %756 = vmatprep.subr.bf16.mxu0 %v915_v12  ;;  %v930_v27 = vld [vmem:[%s1212_s1 + $0xb0] sm:$0xff]   ;;  %v934_v33 = vld [vmem:[%s1212_s1 + $0xb8] sm:$0xff]   ;;  %470 = vmatprep.mubr.bf16.mxu0 %v29_v32  ;;  %v936_v39 = vld [vmem:[%s1212_s1 + $0x100] sm:$0xff]  }
   0xd   :  { %777 = vmatpush3.bf16.msra.mxu1 %v914_v11  ;;  %v24_v37 = vld [vmem:[%s1213_s0 + $0x18] sm:$0xff]  ;;  %v23_v40 = vld [vmem:[%s1213_s0 + $0x10] sm:$0xff]  ;;  %v937_v42 = vld [vmem:[%s1212_s1 + $0x148] sm:$0xff]  }
   0xe   :  { %778 = vmatprep.subr.bf16.mxu1 %v917_v14  ;;  %v31_v38 = vpack.c.bf16 %v24_v37, %v24_v37  ;;  %v30_v41 = vpack.c.bf16 %v23_v40, %v23_v40  ;;  %v938_v43 = vld [vmem:[%s1212_s1 + $0x108] sm:$0xff]   ;;  %v939_v45 = vld [vmem:[%s1212_s1 + $0x150] sm:$0xff]   ;;  %v941_v47 = vld [vmem:[%s1212_s1 + $0x158] sm:$0xff]  }
   0xf   :  { %757 = vmatpush3.bf16.msra.mxu0 %v916_v13  ;;  %v940_v46 = vld [vmem:[%s1212_s1 + $0x110] sm:$0xff]   ;;  %v942_v48 = vld [vmem:[%s1212_s1 + $0x118] sm:$0xff]   ;;  %v943_v49 = vld [vmem:[%s1212_s1 + $0x160] sm:$0xff]  }
  0x10   :  { %758 = vmatprep.subr.bf16.mxu0 %v919_v16  ;;  %510 = vmatprep.mubr.bf16.mxu1 %v31_v38  ;;  %v944_v50 = vld [vmem:[%s1212_s1 + $0x120] sm:$0xff]   ;;  %v945_v51 = vld [vmem:[%s1212_s1 + $0x168] sm:$0xff]   ;;  %v27_v55 = vld [vmem:[%s1213_s0 + $0x30] sm:$0xff] }
  0x11   :  { %779 = vmatpush3.bf16.msra.mxu1 %v918_v15  ;;  %v951_v52 = vld [vmem:[%s1212_s1 + $0x180] sm:$0xff]   ;;  %v26_v53 = vld [vmem:[%s1213_s0 + $0x28] sm:$0xff]  ;;  %v34_v57 = vpack.c.bf16 %v27_v55, %v27_v55  ;;  %v947_v58 = vld [vmem:[%s1212_s1 + $0x170] sm:$0xff]  }
  0x12   :  { %780 = vmatprep.subr.bf16.mxu1 %v921_v18  ;;  %v33_v54 = vpack.c.bf16 %v26_v53, %v26_v53  ;;  %v946_v56 = vld [vmem:[%s1212_s1 + $0x128] sm:$0xff]   ;;  %v948_v59 = vld [vmem:[%s1212_s1 + $0x130] sm:$0xff]   ;;  %v949_v60 = vld [vmem:[%s1212_s1 + $0x178] sm:$0xff]  }
  0x13   :  { %759 = vmatpush3.bf16.msra.mxu0 %v920_v17  ;;  %v950_v61 = vld [vmem:[%s1212_s1 + $0x138] sm:$0xff]   ;;  %v25_v62 = vld [vmem:[%s1213_s0 + $0x20] sm:$0xff]  ;;  %v600_v2 = vld [vmem:[%s1214_s3 + $0x8] sm:$0xff] }
  0x14   :  { %760 = vmatprep.subr.bf16.mxu0 %v923_v20  ;;  %v32_v63 = vpack.c.bf16 %v25_v62, %v25_v62  ;;  %v599_v1 = vld [vmem:[%s1214_s3] sm:$0xff]  ;;  %v601_v3 = vld [vmem:[%s1214_s3 + $0x10] sm:$0xff]  ;;  %v602_v5 = vld [vmem:[%s1214_s3 + $0x18] sm:$0xff] }
  0x15   :  { %781 = vmatpush3.bf16.msra.mxu1 %v922_v19  ;;  %v877_v4 = vpack.c.bf16 %v600_v2, %v599_v1  ;;  %v880_v6 = vpack.c.bf16 %v602_v5, %v601_v3  ;;  %v603_v7 = vld [vmem:[%s1214_s3 + $0x20] sm:$0xff]  ;;  %v604_v8 = vld [vmem:[%s1214_s3 + $0x28] sm:$0xff]  ;;  %v605_v10 = vld [vmem:[%s1214_s3 + $0x30] sm:$0xff] }
  0x16   :  { %782 = vmatprep.subr.bf16.mxu1 %v925_v22  ;;  %v883_v9 = vpack.c.bf16 %v604_v8, %v603_v7  ;;  %v606_v11 = vld [vmem:[%s1214_s3 + $0x38] sm:$0xff]  ;;  %v607_v13 = vld [vmem:[%s1214_s3 + $0x40] sm:$0xff]  ;;  %v608_v14 = vld [vmem:[%s1214_s3 + $0x48] sm:$0xff] }
  0x17   :  { %761 = vmatpush3.bf16.msra.mxu0 %v924_v21  ;;  %v886_v12 = vpack.c.bf16 %v606_v11, %v605_v10  ;;  %v889_v15 = vpack.c.bf16 %v608_v14, %v607_v13  ;;  %v609_v16 = vld [vmem:[%s1214_s3 + $0x50] sm:$0xff]  ;;  %v610_v17 = vld [vmem:[%s1214_s3 + $0x58] sm:$0xff]  ;;  %v611_v19 = vld [vmem:[%s1214_s3 + $0x60] sm:$0xff] }
  0x18   :  { %762 = vmatprep.subr.bf16.mxu0 %v927_v24  ;;  %v892_v18 = vpack.c.bf16 %v610_v17, %v609_v16  ;;  %v612_v20 = vld [vmem:[%s1214_s3 + $0x68] sm:$0xff]  ;;  %v613_v22 = vld [vmem:[%s1214_s3 + $0x70] sm:$0xff] }
  0x19   :  { %783 = vmatpush3.bf16.msra.mxu1 %v926_v23  ;;  %v895_v21 = vpack.c.bf16 %v612_v20, %v611_v19  ;;  %v614_v23 = vld [vmem:[%s1214_s3 + $0x78] sm:$0xff] }
  0x1a   :  { %784 = vmatprep.subr.bf16.mxu1 %v929_v26  ;;  %v898_v24 = vpack.c.bf16 %v614_v23, %v613_v22  ;;  %v698_v26 = vld [vmem:[%s1215_s2] ss:$0 sm:$0xff] }
  0x1b   :  { %763 = vmatpush3.bf16.msra.mxu0 %v928_v25 }
  0x1c   :  { %764 = vmatprep.subr.bf16.mxu0 %v931_v28 }
  0x1d   :  { %785 = vmatpush3.bf16.msra.mxu1 %v930_v27 }
  0x1e   :  { %786 = vmatprep.subr.bf16.mxu1 %v933_v30 }
  0x1f   :  { %765 = vmatpush3.bf16.msra.mxu0 %v932_v29 }
  0x20   :  { %794 = vmatprep.subr.bf16.mxu0 %v935_v36 }
  0x21   :  { %787 = vmatpush3.bf16.msra.mxu1 %v934_v33 }
  0x22   :  { %471 = vmatmul.mubr.bf16.vlgmr.msra.gmra.mrb[0].mxu0 %v28_v35  ;;  %835 = vmatprep.subr.bf16.mxu1 %v952_v44 }
  0x23   :  { %795 = vmatpush3.bf16.msra.mxu0 %v936_v39  ;;  %550 = vmatprep.mubr.bf16.mxu0 %v33_v54 }
  0x24   :  { %511 = vmatmul.mubr.bf16.vlgmr.msra.gmra.mrb[0].mxu1 %v30_v41  ;;  %796 = vmatprep.subr.bf16.mxu0 %v937_v42 }
  0x25   :  { %837 = vmatprep.mubr.msk.bf16.mxu1 %vm953_vm0, %v952_v44  ;;  %836 = vmatpush3.bf16.msra.mxu1 %v951_v52 }
  0x26   :  { %876 = vmatprep.subr.bf16.mxu1 %v954_v0 }
  0x27   :  { %797 = vmatpush3.bf16.msra.mxu0 %v938_v43 }
  0x28   :  { %798 = vmatprep.subr.bf16.mxu0 %v939_v45 }
  0x2b   :  { %799 = vmatpush3.bf16.msra.mxu0 %v940_v46 }
  0x2c   :  { %800 = vmatprep.subr.bf16.mxu0 %v941_v47  ;;  %838 = vmatmul.mubr.msk.bf16.vlgmr.msra.gmra.mrb[4].mxu1 %vm434_vm1, %v34_v57 }
  0x2d   :  { %873 = vmatprep.mubr.msk.f32.mxu1 %vm953_vm0, %v952_v44  ;;  %878 = vmatpush3.bf16.msra.mxu1 %v877_v4 }
  0x2e   :  { %879 = vmatprep.subr.bf16.mxu1 %v954_v0 }
  0x2f   :  { %801 = vmatpush3.bf16.msra.mxu0 %v942_v48 }
  0x30   :  { %802 = vmatprep.subr.bf16.mxu0 %v943_v49 }
  0x31   :  { %881 = vmatpush3.bf16.msra.mxu1 %v880_v6 }
  0x32   :  { %882 = vmatprep.subr.bf16.mxu1 %v954_v0 }
  0x33   :  { %803 = vmatpush3.bf16.msra.mxu0 %v944_v50  ;;  %v749_v50 = vld [vmem:[%s1216_s4] ss:$0 sm:$0xff] }
  0x34   :  { %804 = vmatprep.subr.bf16.mxu0 %v945_v51 }
  0x35   :  { %884 = vmatpush3.bf16.msra.mxu1 %v883_v9 }
  0x36   :  { %885 = vmatprep.subr.bf16.mxu1 %v954_v0 }
  0x37   :  { %805 = vmatpush3.bf16.msra.mxu0 %v946_v56 }
  0x38   :  { %806 = vmatprep.subr.bf16.mxu0 %v947_v58 }
  0x39   :  { %887 = vmatpush3.bf16.msra.mxu1 %v886_v12 }
  0x3a   :  { %888 = vmatprep.subr.bf16.mxu1 %v954_v0 }
  0x3b   :  { %807 = vmatpush3.bf16.msra.mxu0 %v948_v59 }
  0x3c   :  { %808 = vmatprep.subr.bf16.mxu0 %v949_v60 }
  0x3d   :  { %890 = vmatpush3.bf16.msra.mxu1 %v889_v15 }
  0x3e   :  { %891 = vmatprep.subr.bf16.mxu1 %v954_v0 }
  0x3f   :  { %809 = vmatpush3.bf16.msra.mxu0 %v950_v61 }
  0x41   :  { %893 = vmatpush3.bf16.msra.mxu1 %v892_v18 }
  0x42   :  { %551 = vmatmul.mubr.bf16.vlgmr.msra.gmra.mrb[4].mxu0 %v32_v63  ;;  %894 = vmatprep.subr.bf16.mxu1 %v954_v0 }
  0x45   :  { %896 = vmatpush3.bf16.msra.mxu1 %v895_v21 }
  0x46   :  { %897 = vmatprep.subr.bf16.mxu1 %v954_v0 }
  0x49   :  { %899 = vmatpush3.bf16.msra.mxu1 %v898_v24 }
  0xf5   :  { %v766_v25 = vpop.f32.mrb[0].mxu0 }
  0xf6   :  { %v767_v27 = vpop.f32.mrb[1].mxu0 }
  0xf7   :  { %v768_v28 = vadd.f32 %v767_v27, %v766_v25  ;;  %v769_v29 = vpop.f32.mrb[2].mxu0  ;;  %v788_v30 = vpop.f32.mrb[0].mxu1 }
  0xf8   :  { %v770_v31 = vpop.f32.mrb[3].mxu0  ;;  %v789_v33 = vpop.f32.mrb[1].mxu1 }
  0xf9   :  { %v473_v32 = vadd.f32 %v768_v28, %v698_v26  ;;  %v790_v34 = vadd.f32 %v789_v33, %v788_v30  ;;  %v791_v35 = vpop.f32.mrb[2].mxu1 }
  0xfa   :  { %v792_v36 = vpop.f32.mrb[3].mxu1 }
  0xfb   :  { %v513_v37 = vadd.f32 %v790_v34, %v473_v32 }
  0xff   :  { %v592_v38 = vpop.f32.mrb[4].mxu1 }
 0x100   :  { %v839_v39 = vpop.f32.mrb[5].mxu1 }
 0x101   :  { %v595_v40 = vpop.f32.mrb[6].mxu1 }
 0x102   :  { %v840_v41 = vpop.f32.mrb[7].mxu1 }
 0x115   :  { %v810_v42 = vpop.f32.mrb[4].mxu0 }
 0x116   :  { %v811_v43 = vpop.f32.mrb[5].mxu0 }
 0x117   :  { %v812_v44 = vadd.f32 %v811_v43, %v810_v42  ;;  %v813_v45 = vpop.f32.mrb[6].mxu0 }
 0x118   :  { %v814_v46 = vpop.f32.mrb[7].mxu0 }
 0x119   :  { %v553_v47 = vadd.f32 %v812_v44, %v513_v37 }
 0x11b   :  { %v593_v48 = vadd.f32 %v592_v38, %v553_v47 }
 0x11d   :  { %v598_v49 = vmax.f32 %v593_v48, 0.0 }
 0x11f   :  { %874 = vmatmul.mubr.f32.vlgmr.msra.gmra.mrb[8].mxu1 %v598_v49 }
 0x1f2   :  { %v688_v51 = vpop.f32.mrb[8].mxu1 }
 0x1f3   :  { %v689_v52 = vadd.f32 %v749_v50, %v688_v51  ;;  %v875_v53 = vpop.f32.mrb[9].mxu1 }
 0x1f5   :  { %v692_v54 = vpack.c.bf16 %v689_v52, %v689_v52 }
 0x1f7   :  { %693 = vst [vmem:[%s1217_s5] sm:$0xf] %v692_v54 }

</bundles_post_ra>
